<compile_context>
chip_gen: v7x
topology: tpu7x:2x2x1
jax: 0.10.0
libtpu: 0.0.40
codegen_flags: <defaults>
</compile_context>

<pallas_src>
import functools

import jax
import jax.numpy as jnp
from jax.experimental import pallas as pl
from jax.experimental.pallas import tpu as pltpu


def _residual_block_kernel(x_ref, params_ref, w_ref, o_ref, *,
                           kernel_size, eps, matmul_dtype, use_im2col):
    """One batch tile per grid step, NCL layout.

    x_ref      : (TB, C, L)  input tile (channels-first, like the PyTorch module)
    params_ref : (3, C, 1)   [LayerNorm gamma, LayerNorm beta, Conv1d bias]
    w_ref      : (C, K*C)    conv weight, w[co, k*C + ci]   (im2col path, C < 128)
                 (K, C, C)   conv weight, w[k, co, ci]       (accum path, C >= 128)
    o_ref      : (TB, C, L)  output tile
    """
    K = kernel_size
    pad = (K - 1) // 2
    TB, C, L = x_ref.shape

    gamma = params_ref[0].astype(jnp.float32)   # (C, 1)
    beta = params_ref[1].astype(jnp.float32)    # (C, 1)
    bias = params_ref[2].astype(jnp.float32)    # (C, 1)

    # bf16 zero-pad columns, hoisted out of the batch loop (JAX does not CSE
    # broadcasts, so build constants once).
    zpad = jnp.zeros((C, pad), matmul_dtype) if pad > 0 else None

    def body(b, carry):
        xb = x_ref[b].astype(jnp.float32)                    # (C, L) residual input

        # ---- LayerNorm over the channel (sublane) axis ----
        mean = jnp.mean(xb, axis=0, keepdims=True)           # (1, L)
        cent = xb - mean
        var = jnp.mean(cent * cent, axis=0, keepdims=True)
        xn = (cent * jax.lax.rsqrt(var + eps)) * gamma + beta  # (C, L) f32

        # ---- Conv1d, padding='same', stride 1 ----
        # Cast BEFORE tap construction: pad / slice / concat all run in bf16.
        xn_mm = xn.astype(matmul_dtype)
        xp = jnp.concatenate([zpad, xn_mm, zpad], axis=1) if pad > 0 else xn_mm
        taps = [jax.lax.slice_in_dim(xp, k, k + L, axis=1) for k in range(K)]

        if use_im2col:
            # Small C: one fused MXU matmul with contraction depth K*C.
            r = jnp.concatenate(taps, axis=0)                 # (K*C, L) bf16
            y = jnp.dot(w_ref[...], r, preferred_element_type=jnp.float32)
        else:
            # Large C: K accumulated (C, C) @ (C, L) matmuls, f32 accumulation.
            y = jnp.dot(w_ref[0], taps[0], preferred_element_type=jnp.float32)
            for k in range(1, K):
                y = y + jnp.dot(w_ref[k], taps[k], preferred_element_type=jnp.float32)

        # ---- bias + ReLU ----
        y = jnp.maximum(y + bias, 0.0)

        # ---- Dropout: identity in eval mode ----
        # TODO(synk): training-mode dropout (pltpu.prng_seed + prng_random_bits
        #             mask with 1/(1-p) scaling) not emitted; matches module.eval().

        # ---- Residual add ----
        o_ref[b] = (y + xb).astype(o_ref.dtype)
        return carry

    # fori_loop (not an unrolled Python for) bounds the live set to one batch
    # element, so TB > 1 does not cause vreg spills.
    jax.lax.fori_loop(0, TB, body, 0)


def _vmem_config():
    """Generation-aware (scratch budget, vmem_limit_bytes, max batch tile)."""
    vmem_bytes = 64 * 1024 * 1024
    try:
        info = pltpu.get_tpu_info()
        v = getattr(info, "vmem_capacity_bytes", None)
        if v:
            vmem_bytes = int(v)
    except Exception:
        pass
    if vmem_bytes <= 64 * 1024 * 1024:
        # v7x-class chip: 64 MiB physical VMEM per TensorCore.
        return 24 * 1024 * 1024, 48 * 1024 * 1024, 8
    # v5e / v6e class: 128 MiB physical VMEM.
    return 60 * 1024 * 1024, 100 * 1024 * 1024, 16


def _choose_batch_tile(B, C, L, K, x_itemsize, mm_itemsize, use_im2col,
                       budget_bytes, max_tile):
    """Largest batch tile fitting the VMEM budget, preferring a grid of >= 2
    (ideally even) steps so dual-TensorCore chips (v7x) keep both cores busy."""
    pad = (K - 1) // 2
    # Resident weight + single-batch-element temporaries (fori_loop bounds the
    # live set to one element regardless of TB).
    fixed = K * C * C * mm_itemsize                         # conv weight
    fixed += C * L * 8                                      # xb (f32) + y (f32)
    fixed += C * (L + 2 * pad) * mm_itemsize                # padded LN output
    fixed += (K * C * L * mm_itemsize) if use_im2col else (C * L * mm_itemsize)
    # Per-batch-element footprint: double-buffered input + output tiles.
    per_elem = 4 * C * L * x_itemsize
    avail = max(budget_bytes - fixed, per_elem)
    tb = int(max(1, min(B, max_tile, avail // per_elem)))
    if B >= 2:
        tb = max(1, min(tb, B // 2))                        # grid >= 2 steps
    divisors = [d for d in range(tb, 0, -1) if B % d == 0]
    for d in divisors:
        # Mildly prefer an even grid (megacore split), without shrinking the
        # tile by more than 2x.
        if (B // d) % 2 == 0 and 2 * d >= divisors[0]:
            return d
    return divisors[0]


def residual_block(x_ncl, gamma, beta, conv_w, conv_b, *, eps=1e-5,
                   matmul_dtype=jnp.bfloat16, batch_tile=None):
    """x_ncl: (B, C, L) like the PyTorch module.  Returns (B, C, L)."""
    B, C, L = x_ncl.shape
    c_out, c_in, K = conv_w.shape
    assert c_out == C and c_in == C, "Conv1d must map hidden_dim -> hidden_dim"
    assert K % 2 == 1, "padding='same' path implemented for odd kernel sizes"
    # TODO(synk): for very large C*L (e.g. C=1024, L=32768) add an L-tiling grid
    #             axis with a (K-1)-column halo so a single tile fits v7x's
    #             64 MiB VMEM; not needed at the shapes exercised here.

    use_im2col = C < 128   # small C: fused (C,K*C)@(K*C,L); large C: K matmuls

    mm_itemsize = jnp.dtype(matmul_dtype).itemsize
    budget, vmem_limit, max_tile = _vmem_config()
    TB = (batch_tile if batch_tile is not None else
          _choose_batch_tile(B, C, L, K, x_ncl.dtype.itemsize, mm_itemsize,
                             use_im2col, budget, max_tile))
    assert B % TB == 0, "batch tile must divide batch size"

    # One-time parameter plumbing (no per-call transposes of x).  gamma / beta /
    # conv bias merged into a single (3, C, 1) array: one BlockSpec, one DMA.
    params = jnp.stack([
        gamma.reshape(C, 1), beta.reshape(C, 1), conv_b.reshape(C, 1),
    ]).astype(jnp.float32)

    if use_im2col:
        # w_flat[co, k*C + ci] = conv_w[co, ci, k]
        w = jnp.transpose(conv_w, (0, 2, 1)).reshape(C, K * C).astype(matmul_dtype)
        w_spec = pl.BlockSpec((C, K * C), lambda i: (0, 0))
    else:
        # w[k, co, ci] = conv_w[co, ci, k]
        w = jnp.transpose(conv_w, (2, 0, 1)).astype(matmul_dtype)     # (K, C, C)
        w_spec = pl.BlockSpec((K, C, C), lambda i: (0, 0, 0))

    kernel = functools.partial(_residual_block_kernel, kernel_size=K, eps=eps,
                               matmul_dtype=matmul_dtype, use_im2col=use_im2col)

    return pl.pallas_call(
        kernel,
        out_shape=jax.ShapeDtypeStruct((B, C, L), x_ncl.dtype),
        grid_spec=pltpu.PrefetchScalarGridSpec(
            num_scalar_prefetch=0,
            grid=(B // TB,),
            in_specs=[
                pl.BlockSpec((TB, C, L), lambda i: (i, 0, 0)),   # x (NCL)
                pl.BlockSpec((3, C, 1), lambda i: (0, 0, 0)),    # gamma/beta/bias
                w_spec,                                          # conv weight
            ],
            out_specs=pl.BlockSpec((TB, C, L), lambda i: (i, 0, 0)),
        ),
        compiler_params=pltpu.CompilerParams(
            dimension_semantics=("parallel",),
            vmem_limit_bytes=vmem_limit),
        cost_estimate=pl.CostEstimate(
            flops=2 * B * L * K * C * C,
            transcendentals=B * L,
            bytes_accessed=(2 * B * C * L * x_ncl.dtype.itemsize
                            + int(w.size) * mm_itemsize
                            + int(params.size) * 4)),
    )(x_ncl, params, w)


if __name__ == "__main__":
    def ref(x_ncl, gamma, beta, conv_w, conv_b, eps=1e-5):
        # Plain-JAX f32 reference of the same math (eval-mode module).
        xb = jnp.transpose(x_ncl, (0, 2, 1))                 # (B, L, C)
        mu = jnp.mean(xb, axis=-1, keepdims=True)
        va = jnp.mean((xb - mu) ** 2, axis=-1, keepdims=True)
        xn = (xb - mu) / jnp.sqrt(va + eps) * gamma + beta
        xn_ncl = jnp.transpose(xn, (0, 2, 1))                # (B, C, L)
        y = jax.lax.conv_general_dilated(
            xn_ncl, conv_w, window_strides=(1,), padding="SAME",
            dimension_numbers=("NCH", "OIH", "NCH"))
        y = jnp.maximum(y + conv_b[None, :, None], 0.0)
        return y + x_ncl

    key = jax.random.PRNGKey(0)

    def check(B, C, L, K, tol):
        k = jax.random.fold_in(key, C * 1000 + K)
        kx, kg, kb, kw, kc = jax.random.split(k, 5)
        x = jax.random.normal(kx, (B, C, L), dtype=jnp.float32)
        gamma = 1.0 + 0.01 * jax.random.normal(kg, (C,), dtype=jnp.float32)
        beta = 0.01 * jax.random.normal(kb, (C,), dtype=jnp.float32)
        conv_w = 0.1 * jax.random.normal(kw, (C, C, K), dtype=jnp.float32)
        conv_b = 0.01 * jax.random.normal(kc, (C,), dtype=jnp.float32)

        out = jax.block_until_ready(residual_block(x, gamma, beta, conv_w, conv_b))
        ref_out = ref(x, gamma, beta, conv_w, conv_b)
        err = float(jnp.max(jnp.abs(out - ref_out)))
        assert out.shape == (B, C, L)
        # Kernel uses bf16 MXU operands (f32 accumulation); tolerance sized for
        # bf16 rounding vs. the full-f32 reference.
        assert err < tol, (B, C, L, K, err)

    # Small-C path: fused (C, K*C) @ (K*C, L) im2col matmul.
    check(B=2, C=32, L=16, K=5, tol=5e-2)
    # Large-C path: K accumulated (C, C) @ (C, L) matmuls.
    check(B=2, C=128, L=128, K=3, tol=1e-1)

    print("KERNEL_OK")
</pallas_src>

<mosaic_0001>
module attributes {stable_mosaic.version = 11 : i64} {
  func.func @_residual_block_kernel(%arg0: i32, %arg1: memref<1x32x16xf32, #tpu.memory_space<vmem>>, %arg2: memref<3x32x1xf32, #tpu.memory_space<vmem>>, %arg3: memref<32x160xbf16, #tpu.memory_space<vmem>>, %arg4: memref<1x32x16xf32, #tpu.memory_space<vmem>>) attributes {dimension_semantics = [#tpu.dimension_semantics<parallel>], iteration_bounds = array<i64: 2>, scalar_prefetch = 0 : i64, scratch_operands = 0 : i64, tpu.core_type = #tpu.core_type<tc>, window_params = [{transform_indices = @transform_0, window_bounds = array<i64: 1, 32, 16>}, {pipeline_mode = #tpu.pipeline_mode<synchronous>, transform_indices = @transform_1, window_bounds = array<i64: 3, 32, 1>}, {pipeline_mode = #tpu.pipeline_mode<synchronous>, transform_indices = @transform_2, window_bounds = array<i64: 32, 160>}, {transform_indices = @transform_3, window_bounds = array<i64: 1, 32, 16>}]} {
    %c0 = arith.constant 0 : index
    %c0_0 = arith.constant 0 : index
    %c0_1 = arith.constant 0 : index
    %0 = vector.load %arg2[%c0, %c0_0, %c0_1] : memref<3x32x1xf32, #tpu.memory_space<vmem>>, vector<1x32x1xf32>
    %1 = vector.shape_cast %0 : vector<1x32x1xf32> to vector<32x1xf32>
    %c1 = arith.constant 1 : index
    %c0_2 = arith.constant 0 : index
    %c0_3 = arith.constant 0 : index
    %2 = vector.load %arg2[%c1, %c0_2, %c0_3] : memref<3x32x1xf32, #tpu.memory_space<vmem>>, vector<1x32x1xf32>
    %3 = vector.shape_cast %2 : vector<1x32x1xf32> to vector<32x1xf32>
    %c2 = arith.constant 2 : index
    %c0_4 = arith.constant 0 : index
    %c0_5 = arith.constant 0 : index
    %4 = vector.load %arg2[%c2, %c0_4, %c0_5] : memref<3x32x1xf32, #tpu.memory_space<vmem>>, vector<1x32x1xf32>
    %5 = vector.shape_cast %4 : vector<1x32x1xf32> to vector<32x1xf32>
    %cst = arith.constant 0.000000e+00 : bf16
    %6 = vector.broadcast %cst : bf16 to vector<32x2xbf16>
    %c0_i32 = arith.constant 0 : i32
    %7 = arith.index_cast %c0_i32 : i32 to index
    %c0_6 = arith.constant 0 : index
    %c0_7 = arith.constant 0 : index
    %8 = vector.load %arg1[%7, %c0_6, %c0_7] : memref<1x32x16xf32, #tpu.memory_space<vmem>>, vector<1x32x16xf32>
    %9 = vector.shape_cast %8 : vector<1x32x16xf32> to vector<32x16xf32>
    %cst_8 = arith.constant dense<0.000000e+00> : vector<16xf32>
    %10 = vector.multi_reduction <add>, %9, %cst_8 [0] : vector<32x16xf32> to vector<16xf32>
    %11 = vector.shape_cast %10 : vector<16xf32> to vector<1x16xf32>
    %cst_9 = arith.constant 3.200000e+01 : f32
    %12 = vector.broadcast %cst_9 : f32 to vector<1x16xf32>
    %13 = arith.divf %11, %12 : vector<1x16xf32>
    %14 = vector.broadcast %13 : vector<1x16xf32> to vector<32x16xf32>
    %15 = arith.subf %9, %14 : vector<32x16xf32>
    %16 = arith.mulf %15, %15 : vector<32x16xf32>
    %cst_10 = arith.constant dense<0.000000e+00> : vector<16xf32>
    %17 = vector.multi_reduction <add>, %16, %cst_10 [0] : vector<32x16xf32> to vector<16xf32>
    %18 = vector.shape_cast %17 : vector<16xf32> to vector<1x16xf32>
    %cst_11 = arith.constant 3.200000e+01 : f32
    %19 = vector.broadcast %cst_11 : f32 to vector<1x16xf32>
    %20 = arith.divf %18, %19 : vector<1x16xf32>
    %cst_12 = arith.constant 9.99999974E-6 : f32
    %21 = vector.broadcast %cst_12 : f32 to vector<1x16xf32>
    %22 = arith.addf %20, %21 : vector<1x16xf32>
    %23 = math.rsqrt %22 : vector<1x16xf32>
    %24 = vector.broadcast %23 : vector<1x16xf32> to vector<32x16xf32>
    %25 = arith.mulf %15, %24 : vector<32x16xf32>
    %26 = vector.broadcast %1 : vector<32x1xf32> to vector<32x16xf32>
    %27 = arith.mulf %25, %26 : vector<32x16xf32>
    %28 = vector.broadcast %3 : vector<32x1xf32> to vector<32x16xf32>
    %29 = arith.addf %27, %28 : vector<32x16xf32>
    %30 = arith.truncf %29 : vector<32x16xf32> to vector<32x16xbf16>
    %31 = tpu.concatenate %6, %30, %6 in 1 : vector<32x2xbf16>, vector<32x16xbf16>, vector<32x2xbf16> -> vector<32x20xbf16>
    %32 = vector.extract_strided_slice %31 {offsets = [0, 0], sizes = [32, 16], strides = [1, 1]} : vector<32x20xbf16> to vector<32x16xbf16>
    %33 = vector.extract_strided_slice %31 {offsets = [0, 1], sizes = [32, 16], strides = [1, 1]} : vector<32x20xbf16> to vector<32x16xbf16>
    %34 = vector.extract_strided_slice %31 {offsets = [0, 2], sizes = [32, 16], strides = [1, 1]} : vector<32x20xbf16> to vector<32x16xbf16>
    %35 = vector.extract_strided_slice %31 {offsets = [0, 3], sizes = [32, 16], strides = [1, 1]} : vector<32x20xbf16> to vector<32x16xbf16>
    %36 = vector.extract_strided_slice %31 {offsets = [0, 4], sizes = [32, 16], strides = [1, 1]} : vector<32x20xbf16> to vector<32x16xbf16>
    %37 = tpu.concatenate %32, %33, %34, %35, %36 in 0 : vector<32x16xbf16>, vector<32x16xbf16>, vector<32x16xbf16>, vector<32x16xbf16>, vector<32x16xbf16> -> vector<160x16xbf16>
    %c0_13 = arith.constant 0 : index
    %c0_14 = arith.constant 0 : index
    %38 = vector.load %arg3[%c0_13, %c0_14] : memref<32x160xbf16, #tpu.memory_space<vmem>>, vector<32x160xbf16>
    %cst_15 = arith.constant dense<0.000000e+00> : vector<32x16xf32>
    %39 = tpu.matmul %38, %37, %cst_15 {dimension_numbers = #tpu.dot_dimension_numbers<[1], [0], [0], [1], [0, 0, 1, 1], [], []>} : vector<32x160xbf16>, vector<160x16xbf16>, vector<32x16xf32> -> vector<32x16xf32>
    %40 = vector.broadcast %5 : vector<32x1xf32> to vector<32x16xf32>
    %41 = arith.addf %39, %40 : vector<32x16xf32>
    %cst_16 = arith.constant 0.000000e+00 : f32
    %42 = vector.broadcast %cst_16 : f32 to vector<32x16xf32>
    %43 = arith.maximumf %41, %42 : vector<32x16xf32>
    %44 = arith.addf %43, %9 : vector<32x16xf32>
    %45 = arith.index_cast %c0_i32 : i32 to index
    %c0_17 = arith.constant 0 : index
    %c0_18 = arith.constant 0 : index
    %46 = vector.load %arg4[%45, %c0_17, %c0_18] : memref<1x32x16xf32, #tpu.memory_space<vmem>>, vector<1x32x16xf32>
    %47 = vector.shape_cast %46 : vector<1x32x16xf32> to vector<32x16xf32>
    %48 = vector.shape_cast %44 : vector<32x16xf32> to vector<1x32x16xf32>
    tpu.vector_store %arg4[%45, %c0_17, %c0_18], %48 {strides = array<i32>} : memref<1x32x16xf32, #tpu.memory_space<vmem>>, vector<1x32x16xf32>,
    %c1_i32 = arith.constant 1 : i32
    return
  }
  func.func @transform_0(%arg0: i32) -> (i32, i32, i32) {
    %c0_i32 = arith.constant 0 : i32
    %c0_i32_0 = arith.constant 0 : i32
    %c0_i32_1 = arith.constant 0 : i32
    return %arg0, %c0_i32, %c0_i32_0 : i32, i32, i32
  }
  func.func @transform_1(%arg0: i32) -> (i32, i32, i32) {
    %c0_i32 = arith.constant 0 : i32
    %c0_i32_0 = arith.constant 0 : i32
    %c0_i32_1 = arith.constant 0 : i32
    %c0_i32_2 = arith.constant 0 : i32
    return %c0_i32, %c0_i32_0, %c0_i32_1 : i32, i32, i32
  }
  func.func @transform_2(%arg0: i32) -> (i32, i32) {
    %c0_i32 = arith.constant 0 : i32
    %c0_i32_0 = arith.constant 0 : i32
    %c0_i32_1 = arith.constant 0 : i32
    return %c0_i32, %c0_i32_0 : i32, i32
  }
  func.func @transform_3(%arg0: i32) -> (i32, i32, i32) {
    %c0_i32 = arith.constant 0 : i32
    %c0_i32_0 = arith.constant 0 : i32
    %c0_i32_1 = arith.constant 0 : i32
    return %arg0, %c0_i32, %c0_i32_0 : i32, i32, i32
  }
}

</mosaic_0001>

<bundles_post_ra>
// kernel: tpu_custom_call.1
= control target key start
LH: loop header
LB: loop body
LE: loop exit
PB: predicated region body
PF: predicated region fallthrough
CT: control target
= control target key end

     0   :  { %s597_s12 = smov 0   ;;  %s723_s0 = inlined_call_operand.vmem [shape: f32[2,32,16], index: 0, kind: input, shape index: {}]   ;;  %s724_s1 = inlined_call_operand.vmem [shape: f32[3,32,1], index: 1, kind: input, shape index: {}]   ;;  %s725_s2 = inlined_call_operand.vmem [shape: bf16[32,160], index: 2, kind: input, shape index: {}]   ;;  %s726_s3 = inlined_call_operand.vmem [shape: f32[2,32,16], index: 3, kind: output, shape index: {}]  }
   0x1 LB: > { %s492_s13 = sadd.s32 4294967295, %s569_s12   ;;  %p496_p0 = scmp.ge.s32.totalorder %s569_s12, 1  ;;  %s569_s12 = sphi %s597_s12, %s13_s12  }
   0x2   : > { %p137_p1 = scmp.lt.s32.totalorder %s569_s12, 3 }
   0x4   : > { %p138_p2 = pnand %p496_p0, %p137_p1 }
   0x5   : > { %v501_v0 = vld [vmem:[%s724_s1 + $0x20] sm:$0xff] (!%p138_p2)  ;;  %p161_p3 = scmp.lt.s32.totalorder (!%p138_p2), %s492_s13, 1  ;;  %v571_v2 = vmov (!%p138_p2), 0   ;;  %v502_v3 = vld [vmem:[%s724_s1 + $0x28] sm:$0xff] (!%p138_p2)  ;;  %v175_v5 = vld [vmem:[%s724_s1 + $0x18] sm:$0xff] (!%p138_p2)  ;;  %vm190_vm0 = vcmask (!%p138_p2), 130048  }
   0x6   : > { %141 = sbr.rel (%p138_p2) target bundleno = 631 (0x277), region = 32  ;;  %v172_v1 = vld [vmem:[%s724_s1] sm:$0xff] (!%p138_p2)  ;;  %554 = vset.pattern.permute.xlu1 (!%p138_p2), %v571_v2  ;;  %553 = vset.pattern.permute.xlu0 (!%p138_p2), %v571_v2  ;;  %v173_v4 = vld [vmem:[%s724_s1 + $0x8] sm:$0xff] (!%p138_p2)  ;;  %v174_v6 = vld [vmem:[%s724_s1 + $0x10] sm:$0xff] (!%p138_p2)  ;;  %s572_s7 = smov (!%p138_p2), 2   ;;  %vm290_vm1 = vcmask (!%p138_p2), 15360  }
   0x7   : > { %260 = vperm.xlu1 (!%p138_p2), %554, %v501_v0   ;;  %236 = vperm.xlu0 (!%p138_p2), %553, %v172_v1   ;;  %v504_v7 = vld [vmem:[%s724_s1 + $0x38] sm:$0xff] (!%p138_p2)  ;;  %v503_v8 = vld [vmem:[%s724_s1 + $0x30] sm:$0xff] (!%p138_p2)  ;;  %vm296_vm2 = vcmask (!%p138_p2), 146432   ;;  %s573_s8 = smov (!%p138_p2), 127   ;;  %s574_s9 = smov (!%p138_p2), 126   ;;  %vm369_vm3 = vcmask (!%p138_p2), 261120  }
   0x8   : > { %376 = vmatprep.subr.bf16.mxu0 (!%p138_p2), %v571_v2  ;;  %519 = vmatprep.subr.bf16.mxu1 (!%p138_p2), %v571_v2  ;;  %s575_s10 = smov (!%p138_p2), 125   ;;  %s576_s11 = smov (!%p138_p2), 124  }
   0xb   : > { %265 = vperm.xlu1 (!%p138_p2), %554, %v502_v3   ;;  %241 = vperm.xlu0 (!%p138_p2), %553, %v173_v4  }
   0xd   : > { %s728_s13 = smov (!%p161_p3, %s492_s13), 1 }
   0xe   : > { %s517_s26 = sshll.u32 %s728_s13, 5 }
   0xf   : > { %251 = vperm.xlu1 %554, %v175_v5   ;;  %246 = vperm.xlu0 %553, %v174_v6   ;;  %s165_s6 = scalar_lea.vmem %s723_s0, %s517_s26 }
  0x10   : > { %v641_v9 = vld [vmem:[%s165_s6] sm:$0xff]  ;;  %v643_v10 = vld [vmem:[%s165_s6 + $0x8] sm:$0xff]  ;;  %v649_v13 = vld [vmem:[%s165_s6 + $0x10] sm:$0xff] }
  0x11   : > { %v191_v11 = vsel %vm190_vm0, %v641_v9, 0.0  ;;  %v192_v12 = vsel %vm190_vm0, %v643_v10, 0.0  ;;  %v194_v15 = vsel %vm190_vm0, %v649_v13, 0.0  ;;  %v653_v16 = vld [vmem:[%s165_s6 + $0x18] sm:$0xff]  ;;  %s170_s6 = scalar_lea.vmem %s726_s3, %s517_s26 }
  0x12   : > { %v193_v14 = vadd.f32 %v192_v12, %v191_v11  ;;  %v196_v18 = vsel %vm190_vm0, %v653_v16, 0.0 }
  0x13   : > { %275 = vperm.xlu1 %554, %v504_v7   ;;  %270 = vperm.xlu0 %553, %v503_v8  }
  0x14   : > { %v195_v17 = vadd.f32 %v194_v15, %v193_v14 }
  0x16   : > { %v197_v19 = vadd.f32 %v196_v18, %v195_v17 }
  0x18   : > { %v198_v20 = vrot.slane %v197_v19, 4 }
  0x1a   : > { %v199_v21 = vadd.f32 %v198_v20, %v197_v19  ;;  %v505_v20 = vld [vmem:[%s724_s1 + $0x40] sm:$0xff] }
  0x1c   : > { %v200_v22 = vrot.slane %v199_v21, 2 }
  0x1e   : > { %v201_v23 = vadd.f32 %v200_v22, %v199_v21  ;;  %v507_v21 = vld [vmem:[%s724_s1 + $0x50] sm:$0xff]  ;;  %v557_v22 = vld [vmem:[%s725_s2 + $0x4] ss:$8 sps:$4 sm:$0xff]  }
  0x1f   : > { %513 = vmatprep.mubr.msk.bf16.mxu0 %vm369_vm3, %v557_v22 }
  0x20   : > { %v202_v24 = vrot.slane %v201_v23, 1 }
  0x22   : > { %v203_v25 = vadd.f32 %v202_v24, %v201_v23  ;;  %v560_v23 = vld [vmem:[%s725_s2 + $0x14] ss:$8 sps:$4 sm:$0xff]   ;;  %v506_v24 = vld [vmem:[%s724_s1 + $0x48] sm:$0xff] }
  0x23   : > { %514 = vmatprep.mubr.msk.bf16.mxu1 %vm369_vm3, %v560_v23 }
  0x24   : > { %v205_v26 = vmul.f32 0.03125, %v203_v25  ;;  %v508_v25 = vld [vmem:[%s724_s1 + $0x58] sm:$0xff] }
  0x26   : > { %v206_v27 = vsub.f32 %v641_v9, %v205_v26  ;;  %v207_v28 = vsub.f32 %v643_v10, %v205_v26  ;;  %v208_v29 = vsub.f32 %v649_v13, %v205_v26  ;;  %v209_v32 = vsub.f32 %v653_v16, %v205_v26 }
  0x28   : > { %v210_v30 = vmul.f32 %v206_v27, %v206_v27  ;;  %v211_v31 = vmul.f32 %v207_v28, %v207_v28  ;;  %v212_v33 = vmul.f32 %v208_v29, %v208_v29  ;;  %v213_v37 = vmul.f32 %v209_v32, %v209_v32 }
  0x2a   : > { %v214_v34 = vsel %vm190_vm0, %v210_v30, 0.0  ;;  %v215_v35 = vsel %vm190_vm0, %v211_v31, 0.0  ;;  %v217_v38 = vsel %vm190_vm0, %v212_v33, 0.0  ;;  %v219_v40 = vsel %vm190_vm0, %v213_v37, 0.0 }
  0x2b   : > { %v216_v36 = vadd.f32 %v215_v35, %v214_v34  ;;  %v555_v34 = vld [vmem:[%s725_s2] ss:$8 sps:$4 sm:$0xff]   ;;  %v558_v35 = vld [vmem:[%s725_s2 + $0x10] ss:$8 sps:$4 sm:$0xff]  }
  0x2d   : > { %v218_v39 = vadd.f32 %v217_v38, %v216_v36 }
  0x2f   : > { %v220_v41 = vadd.f32 %v219_v40, %v218_v39 }
  0x31   : > { %v221_v42 = vrot.slane %v220_v41, 4 }
  0x33   : > { %v222_v43 = vadd.f32 %v221_v42, %v220_v41 }
  0x35   : > { %v223_v44 = vrot.slane %v222_v43, 2 }
  0x37   : > { %v224_v45 = vadd.f32 %v223_v44, %v222_v43 }
  0x39   : > { %v225_v46 = vrot.slane %v224_v45, 1 }
  0x3b   : > { %v226_v47 = vadd.f32 %v225_v46, %v224_v45 }
  0x3d   : > { %v227_v48 = vmul.f32 0.03125, %v226_v47 }
  0x3f   : > { %v228_v49 = vadd.f32 1e-05, %v227_v48 }
  0x41   : > { %561 = vrsqrt.f32 %v228_v49 }
  0x4b   : > { %v562_v50 = vpop.eup %561 }
  0x4c   : > { %v230_v51 = vmul.f32 %v562_v50, %v206_v27  ;;  %v231_v54 = vmul.f32 %v562_v50, %v207_v28  ;;  %v233_v61 = vmul.f32 %v562_v50, %v209_v32  ;;  %v232_v62 = vmul.f32 %v562_v50, %v208_v29 }
  0x86   : > { %v261_v52 = vpop.permute.xlu1 %260  ;;  %v237_v53 = vpop.permute.xlu0 %236 }
  0x87   : > { %v254_v55 = vmul.f32 %v237_v53, %v230_v51 }
  0x89   : > { %v278_v59 = vadd.f32 %v261_v52, %v254_v55 }
  0x8a   : > { %v266_v56 = vpop.permute.xlu1 %265  ;;  %v242_v57 = vpop.permute.xlu0 %241 }
  0x8b   : > { %v255_v58 = vmul.f32 %v242_v57, %v231_v54 }
  0x8d   : > { %v279_v60 = vadd.f32 %v266_v56, %v255_v58 }
  0x8e   : > { %v252_v63 = vpop.permute.xlu1 %251  ;;  %v247_v0 = vpop.permute.xlu0 %246 }
  0x8f   : > { %v282_v1 = vpack.c.bf16 %v279_v60, %v278_v59  ;;  %v257_v3 = vmul.f32 %v252_v63, %v233_v61  ;;  %v256_v4 = vmul.f32 %v247_v0, %v232_v62 }
  0x91   : > { %286 = vrot.lane.b32.xlu0 %v282_v1, %s572_s7 }
  0x92   : > { %v276_v5 = vpop.permute.xlu1 %275  ;;  %v271_v6 = vpop.permute.xlu0 %270 }
  0x93   : > { %v281_v7 = vadd.f32 %v276_v5, %v257_v3  ;;  %v280_v8 = vadd.f32 %v271_v6, %v256_v4 }
  0x95   : > { %v283_v11 = vpack.c.bf16 %v281_v7, %v280_v8 }
  0x97   : > { %288 = vrot.lane.b32.xlu1 %v283_v11, %s572_s7 }
 0x103   : > { %v287_v12 = vpop.permute.xlu0 %286 }
 0x104   : > { %v293_v14 = vsel %vm290_vm1, 0, %v287_v12 }
 0x105   : > { %v297_v15 = vsel %vm296_vm2, %v293_v14, 0 }
 0x106   : > { %303 = vrot.lane.b32.xlu0 %v297_v15, %s573_s8  ;;  %377 = vmatpush1.bf16.msra.mxu0 %v297_v15 }
 0x107   : > { %529 = vmatpush1.bf16.msra.mxu1 %v297_v15  ;;  %378 = vmatprep.subr.bf16.mxu0 %v571_v2 }
 0x108   : > { %520 = vmatprep.subr.bf16.mxu1 %v571_v2 }
 0x109   : > { %v289_v17 = vpop.permute.xlu1 %288 }
 0x10a   : > { %v295_v18 = vsel %vm290_vm1, 0, %v289_v17  ;;  %309 = vrot.lane.b32.xlu0 %v297_v15, %s574_s9 }
 0x10b   : > { %v299_v19 = vsel %vm296_vm2, %v295_v18, 0 }
 0x10c   : > { %305 = vrot.lane.b32.xlu1 %v299_v19, %s573_s8  ;;  %379 = vmatpush1.bf16.msra.mxu0 %v299_v19 }
 0x10d   : > { %530 = vmatpush1.bf16.msra.mxu1 %v299_v19  ;;  %380 = vmatprep.subr.bf16.mxu0 %v571_v2 }
 0x10e   : > { %315 = vrot.lane.b32.xlu0 %v297_v15, %s575_s10  ;;  %521 = vmatprep.subr.bf16.mxu1 %v571_v2 }
 0x110   : > { %311 = vrot.lane.b32.xlu1 %v299_v19, %s574_s9 }
 0x112   : > { %321 = vrot.lane.b32.xlu0 %v297_v15, %s576_s11 }
 0x114   : > { %317 = vrot.lane.b32.xlu1 %v299_v19, %s575_s10 }
 0x116   : > { %333 = vperm.xlu0 %553, %v505_v20  }
 0x118   : > { %323 = vrot.lane.b32.xlu1 %v299_v19, %s576_s11 }
 0x11a   : > { %343 = vperm.xlu0 %553, %v507_v21  }
 0x11c   : > { %338 = vperm.xlu1 %554, %v506_v24  }
 0x120   : > { %348 = vperm.xlu1 %554, %v508_v25  }
 0x178   : > { %v304_v26 = vpop.permute.xlu0 %303 }
 0x179   : > { %381 = vmatpush1.bf16.msra.mxu0 %v304_v26  ;;  %531 = vmatpush1.bf16.msra.mxu1 %v304_v26 }
 0x17a   : > { %382 = vmatprep.subr.bf16.mxu0 %v571_v2  ;;  %522 = vmatprep.subr.bf16.mxu1 %v571_v2 }
 0x17c   : > { %v310_v28 = vpop.permute.xlu0 %309 }
 0x17e   : > { %v306_v27 = vpop.permute.xlu1 %305 }
 0x17f   : > { %383 = vmatpush1.bf16.msra.mxu0 %v306_v27  ;;  %532 = vmatpush1.bf16.msra.mxu1 %v306_v27 }
 0x180   : > { %384 = vmatprep.subr.bf16.mxu0 %v571_v2  ;;  %523 = vmatprep.subr.bf16.mxu1 %v571_v2  ;;  %v316_v30 = vpop.permute.xlu0 %315 }
 0x182   : > { %v312_v29 = vpop.permute.xlu1 %311 }
 0x183   : > { %385 = vmatpush1.bf16.msra.mxu0 %v310_v28  ;;  %533 = vmatpush1.bf16.msra.mxu1 %v310_v28 }
 0x184   : > { %386 = vmatprep.subr.bf16.mxu0 %v571_v2  ;;  %524 = vmatprep.subr.bf16.mxu1 %v571_v2  ;;  %v322_v32 = vpop.permute.xlu0 %321 }
 0x186   : > { %v318_v31 = vpop.permute.xlu1 %317 }
 0x187   : > { %387 = vmatpush1.bf16.msra.mxu0 %v312_v29  ;;  %534 = vmatpush1.bf16.msra.mxu1 %v312_v29 }
 0x188   : > { %388 = vmatprep.subr.bf16.mxu0 %v571_v2  ;;  %525 = vmatprep.subr.bf16.mxu1 %v571_v2 }
 0x18a   : > { %v324_v33 = vpop.permute.xlu1 %323 }
 0x18b   : > { %389 = vmatpush1.bf16.msra.mxu0 %v316_v30  ;;  %535 = vmatpush1.bf16.msra.mxu1 %v316_v30 }
 0x18c   : > { %390 = vmatprep.subr.bf16.mxu0 %v571_v2  ;;  %526 = vmatprep.subr.bf16.mxu1 %v571_v2 }
 0x18f   : > { %391 = vmatpush1.bf16.msra.mxu0 %v318_v31  ;;  %536 = vmatpush1.bf16.msra.mxu1 %v318_v31 }
 0x190   : > { %392 = vmatprep.subr.bf16.mxu0 %v571_v2  ;;  %527 = vmatprep.subr.bf16.mxu1 %v571_v2 }
 0x193   : > { %393 = vmatpush1.bf16.msra.mxu0 %v322_v32  ;;  %537 = vmatpush1.bf16.msra.mxu1 %v322_v32 }
 0x194   : > { %394 = vmatprep.subr.bf16.mxu0 %v571_v2  ;;  %528 = vmatprep.subr.bf16.mxu1 %v571_v2 }
 0x195   : > { %v334_v36 = vpop.permute.xlu0 %333 }
 0x197   : > { %395 = vmatpush1.bf16.msra.mxu0 %v324_v33  ;;  %538 = vmatpush1.bf16.msra.mxu1 %v324_v33 }
 0x199   : > { %v344_v38 = vpop.permute.xlu0 %343 }
 0x19a   : > { %409 = vmatmul.mubr.bf16.vlgmr.msra.gmra.mrb[0].mxu0 %v555_v34  ;;  %417 = vmatmul.mubr.bf16.vlgmr.msra.gmra.mrb[0].mxu1 %v558_v35 }
 0x19b   : > { %v339_v37 = vpop.permute.xlu1 %338 }
 0x19f   : > { %v349_v39 = vpop.permute.xlu1 %348 }
 0x26d   : > { %v410_v40 = vpop.f32.mrb[0].mxu0  ;;  %v418_v2 = vpop.f32.mrb[0].mxu1 }
 0x26e   : > { %v411_v41 = vadd.f32 %v410_v40, %v334_v36  ;;  %v419_v42 = vadd.f32 %v418_v2, %v344_v38  ;;  %v412_v43 = vpop.f32.mrb[1].mxu0  ;;  %v420_v44 = vpop.f32.mrb[1].mxu1 }
 0x26f   : > { %v413_v45 = vpop.f32.mrb[2].mxu0  ;;  %v421_v46 = vpop.f32.mrb[2].mxu1 }
 0x270   : > { %v425_v47 = vmax.f32 %v411_v41, 0.0  ;;  %v427_v48 = vmax.f32 %v419_v42, 0.0  ;;  %v414_v49 = vadd.f32 %v413_v45, %v339_v37  ;;  %v422_v50 = vadd.f32 %v421_v46, %v349_v39  ;;  %v415_v51 = vpop.f32.mrb[3].mxu0  ;;  %v423_v52 = vpop.f32.mrb[3].mxu1 }
 0x272   : > { %v429_v53 = vadd.f32 %v425_v47, %v641_v9  ;;  %v431_v54 = vadd.f32 %v427_v48, %v649_v13  ;;  %v426_v55 = vmax.f32 %v414_v49, 0.0  ;;  %v428_v56 = vmax.f32 %v422_v50, 0.0 }
 0x274   : > { %433 = vst.msk [vmem:[%s170_s6] sm:$0xff] %vm190_vm0, %v429_v53  ;;  %435 = vst.msk [vmem:[%s170_s6 + $0x10] sm:$0xff] %vm190_vm0, %v431_v54  ;;  %v430_v57 = vadd.f32 %v426_v55, %v643_v10  ;;  %v432_v58 = vadd.f32 %v428_v56, %v653_v16 }
 0x276   : > { %434 = vst.msk [vmem:[%s170_s6 + $0x8] sm:$0xff] %vm190_vm0, %v430_v57  ;;  %436 = vst.msk [vmem:[%s170_s6 + $0x18] sm:$0xff] %vm190_vm0, %v432_v58 }
 0x277 PF: > { %s13_s12 = sadd.s32 1, %s569_s12  }
 0x278   : > { %p10_p4 = scmp.ge.s32.totalorder %s13_s12, 4  }
 0x27a   :  { %12 = sbr.rel (!%p10_p4) target bundleno = 1 (0x1), region = 64 }

</bundles_post_ra>
